<compile_context>
chip_gen: v6e
topology: v6e:2x2x1
jax: 0.10.0
libtpu: 0.0.40
codegen_flags: <defaults>
</compile_context>

<pallas_src>
import math
import functools

import jax
import jax.numpy as jnp
from jax.experimental import pallas as pl
from jax.experimental.pallas import tpu as pltpu


def _attention_kernel(qe_ref, ke_ref, ve_ref,
                      wq_ref, bq_ref, wk_ref, bk_ref, wv_ref, bv_ref,
                      o_ref, *, num_heads, q_k_hidden_size, output_hidden_size):
    tb, q_len, q_embd_size = qe_ref.shape
    _, k_len, k_embd_size = ke_ref.shape
    _, v_len, v_embd_size = ve_ref.shape
    head_dim = q_k_hidden_size // num_heads
    out_head = output_hidden_size // num_heads
    scale = 1.0 / math.sqrt(q_k_hidden_size)
    in_dtype = qe_ref.dtype

    # ---- Projections: fold the batch tile into the MXU M dimension ----------
    qe = qe_ref[...].reshape(tb * q_len, q_embd_size)
    ke = ke_ref[...].reshape(tb * k_len, k_embd_size)
    ve = ve_ref[...].reshape(tb * v_len, v_embd_size)

    q = jnp.dot(qe, wq_ref[...], preferred_element_type=jnp.float32) + bq_ref[...]
    # Fold the scaled-dot scale into q once (instead of per-head on scores).
    q = q * scale
    k = jnp.dot(ke, wk_ref[...], preferred_element_type=jnp.float32) + bk_ref[...]
    v = jnp.dot(ve, wv_ref[...], preferred_element_type=jnp.float32) + bv_ref[...]

    # Back to [tb, len, hidden]; feed the MXU in the input dtype (full-rate
    # bf16 on v6e/v7x when inputs are bf16; exact no-op cast for f32 inputs).
    q = q.astype(in_dtype).reshape(tb, q_len, q_k_hidden_size)
    k = k.astype(in_dtype).reshape(tb, k_len, q_k_hidden_size)
    v = v.astype(in_dtype).reshape(tb, v_len, output_hidden_size)

    # ---- Per-head scaled-dot attention (static unrolled loop over heads) ----
    head_outs = []
    for h in range(num_heads):
        qh = q[:, :, h * head_dim:(h + 1) * head_dim]      # [tb, q_len, head_dim]
        kh = k[:, :, h * head_dim:(h + 1) * head_dim]      # [tb, k_len, head_dim]
        vh = v[:, :, h * out_head:(h + 1) * out_head]      # [tb, v_len, out_head]

        # Batched QK^T contracting the feature dim -> no explicit K transpose.
        s = jnp.einsum('bqd,bkd->bqk', qh, kh,
                       preferred_element_type=jnp.float32)  # [tb, q_len, k_len]
        # Numerically-stable softmax along the key axis; normalization deferred.
        s = s - jnp.max(s, axis=-1, keepdims=True)
        p = jnp.exp(s)
        l = jnp.sum(p, axis=-1, keepdims=True)              # [tb, q_len, 1]

        o_h = jnp.einsum('bqk,bkd->bqd', p.astype(in_dtype), vh,
                         preferred_element_type=jnp.float32)  # [tb, q_len, out_head]
        # Normalize the small head output instead of the [q_len, k_len] probs.
        # (approx=True would push the reciprocal onto the EUP; keep the exact
        # form here so f32 outputs stay bit-close to the reference.)
        o_h = o_h * pl.reciprocal(l, approx=False)
        head_outs.append(o_h)

    # Single lane-dense store of all heads (matches torch.split + cat(heads, -1)).
    out = jnp.concatenate(head_outs, axis=-1)               # [tb, q_len, output_hidden]
    o_ref[...] = out.astype(o_ref.dtype)


def basic_attention(q_embd, k_embd, v_embd, params, *, num_heads,
                    q_k_hidden_size, output_hidden_size, batch_block=8):
    """Pallas equivalent of BasicAttention.forward with score_func='scaled_dot'."""
    B, q_len, q_embd_size = q_embd.shape
    _, k_len, k_embd_size = k_embd.shape
    _, v_len, v_embd_size = v_embd.shape
    assert k_len == v_len
    assert q_k_hidden_size % num_heads == 0
    assert output_hidden_size % num_heads == 0

    # Batch tile: largest divisor of B that is <= batch_block (no padding
    # needed, keeps >=2 grid steps when B allows -> both TCs busy on v7x).
    tb = max(1, min(batch_block, B))
    while B % tb:
        tb -= 1
    grid_b = B // tb

    wq, bq, wk, bk, wv, bv = params
    bq = bq.reshape(1, -1)
    bk = bk.reshape(1, -1)
    bv = bv.reshape(1, -1)

    kernel = functools.partial(
        _attention_kernel,
        num_heads=num_heads,
        q_k_hidden_size=q_k_hidden_size,
        output_hidden_size=output_hidden_size,
    )

    # Advisory cost estimate for XLA's scheduler.
    flops = 2 * B * (q_len * q_embd_size * q_k_hidden_size
                     + k_len * k_embd_size * q_k_hidden_size
                     + v_len * v_embd_size * output_hidden_size
                     + q_len * k_len * q_k_hidden_size        # QK^T over all heads
                     + q_len * k_len * output_hidden_size)    # PV  over all heads
    transcendentals = B * num_heads * q_len * k_len           # exp in softmax
    itemsize = q_embd.dtype.itemsize
    bytes_accessed = itemsize * (q_embd.size + k_embd.size + v_embd.size
                                 + wq.size + wk.size + wv.size
                                 + bq.size + bk.size + bv.size
                                 + B * q_len * output_hidden_size)

    return pl.pallas_call(
        kernel,
        out_shape=jax.ShapeDtypeStruct((B, q_len, output_hidden_size), q_embd.dtype),
        grid_spec=pltpu.PrefetchScalarGridSpec(
            num_scalar_prefetch=0,
            grid=(grid_b,),
            in_specs=[
                pl.BlockSpec((tb, q_len, q_embd_size), lambda b: (b, 0, 0)),
                pl.BlockSpec((tb, k_len, k_embd_size), lambda b: (b, 0, 0)),
                pl.BlockSpec((tb, v_len, v_embd_size), lambda b: (b, 0, 0)),
                # Weights/biases: constant index_map -> fetched once, reused.
                pl.BlockSpec((q_embd_size, q_k_hidden_size), lambda b: (0, 0)),
                pl.BlockSpec((1, q_k_hidden_size), lambda b: (0, 0)),
                pl.BlockSpec((k_embd_size, q_k_hidden_size), lambda b: (0, 0)),
                pl.BlockSpec((1, q_k_hidden_size), lambda b: (0, 0)),
                pl.BlockSpec((v_embd_size, output_hidden_size), lambda b: (0, 0)),
                pl.BlockSpec((1, output_hidden_size), lambda b: (0, 0)),
            ],
            out_specs=pl.BlockSpec((tb, q_len, output_hidden_size), lambda b: (b, 0, 0)),
        ),
        compiler_params=pltpu.CompilerParams(dimension_semantics=("parallel",)),
        cost_estimate=pl.CostEstimate(flops=int(flops),
                                      transcendentals=int(transcendentals),
                                      bytes_accessed=int(bytes_accessed)),
    )(q_embd, k_embd, v_embd, wq, bq, wk, bk, wv, bv)


def _reference(q_embd, k_embd, v_embd, params, *, num_heads,
               q_k_hidden_size, output_hidden_size):
    """Pure-JAX reference mirroring the PyTorch forward (scaled_dot, no mask)."""
    wq, bq, wk, bk, wv, bv = params
    B, q_len, _ = q_embd.shape
    k_len = k_embd.shape[1]
    head_dim = q_k_hidden_size // num_heads
    out_head = output_hidden_size // num_heads

    q = q_embd @ wq + bq
    k = k_embd @ wk + bk
    v = v_embd @ wv + bv

    q = q.reshape(B, q_len, num_heads, head_dim).transpose(2, 0, 1, 3).reshape(-1, q_len, head_dim)
    k = k.reshape(B, k_len, num_heads, head_dim).transpose(2, 0, 1, 3).reshape(-1, k_len, head_dim)
    v = v.reshape(B, k_len, num_heads, out_head).transpose(2, 0, 1, 3).reshape(-1, k_len, out_head)

    score = jnp.einsum("bqd,bkd->bqk", q, k) / math.sqrt(q_k_hidden_size)
    score = jax.nn.softmax(score, axis=-1)
    out = jnp.einsum("bqk,bkd->bqd", score, v)             # [H*B, q_len, out_head]
    heads = jnp.split(out, num_heads, axis=0)
    return jnp.concatenate(heads, axis=-1)                 # [B, q_len, output_hidden]


if __name__ == "__main__":
    # Module configuration (defaults: q_k_hidden = q_embd, output_hidden = v_embd)
    B, q_len, k_len = 8, 8, 8
    q_embd_size = k_embd_size = v_embd_size = 32
    q_k_hidden_size = q_embd_size
    output_hidden_size = v_embd_size
    num_heads = 2

    key = jax.random.PRNGKey(0)
    keys = jax.random.split(key, 9)
    q_embd = jax.random.normal(keys[0], (B, q_len, q_embd_size), jnp.float32)
    k_embd = jax.random.normal(keys[1], (B, k_len, k_embd_size), jnp.float32)
    v_embd = jax.random.normal(keys[2], (B, k_len, v_embd_size), jnp.float32)

    # Deterministic Linear parameters (stored as [in, out]).
    def init_linear(kw, kb, fan_in, fan_out):
        bound = 1.0 / math.sqrt(fan_in)
        w = jax.random.uniform(kw, (fan_in, fan_out), jnp.float32, -bound, bound)
        b = jax.random.uniform(kb, (fan_out,), jnp.float32, -bound, bound)
        return w, b

    wq, bq = init_linear(keys[3], keys[4], q_embd_size, q_k_hidden_size)
    wk, bk = init_linear(keys[5], keys[6], k_embd_size, q_k_hidden_size)
    wv, bv = init_linear(keys[7], keys[8], v_embd_size, output_hidden_size)
    params = (wq, bq, wk, bk, wv, bv)

    out = basic_attention(q_embd, k_embd, v_embd, params,
                          num_heads=num_heads,
                          q_k_hidden_size=q_k_hidden_size,
                          output_hidden_size=output_hidden_size,
                          batch_block=4)   # 2 batch elems/step would also work; 4 -> grid=(2,)
    out = jax.block_until_ready(out)

    ref = _reference(q_embd, k_embd, v_embd, params,
                     num_heads=num_heads,
                     q_k_hidden_size=q_k_hidden_size,
                     output_hidden_size=output_hidden_size)
    assert out.shape == (B, q_len, output_hidden_size)
    assert jnp.allclose(out, ref, atol=1e-4, rtol=1e-4), "mismatch vs reference"

    print("KERNEL_OK")
</pallas_src>

<mosaic_0001>
module attributes {stable_mosaic.version = 11 : i64} {
  func.func @_attention_kernel(%arg0: i32, %arg1: memref<4x8x32xf32, #tpu.memory_space<vmem>>, %arg2: memref<4x8x32xf32, #tpu.memory_space<vmem>>, %arg3: memref<4x8x32xf32, #tpu.memory_space<vmem>>, %arg4: memref<32x32xf32, #tpu.memory_space<vmem>>, %arg5: memref<1x32xf32, #tpu.memory_space<vmem>>, %arg6: memref<32x32xf32, #tpu.memory_space<vmem>>, %arg7: memref<1x32xf32, #tpu.memory_space<vmem>>, %arg8: memref<32x32xf32, #tpu.memory_space<vmem>>, %arg9: memref<1x32xf32, #tpu.memory_space<vmem>>, %arg10: memref<4x8x32xf32, #tpu.memory_space<vmem>>) attributes {dimension_semantics = [#tpu.dimension_semantics<parallel>], iteration_bounds = array<i64: 2>, scalar_prefetch = 0 : i64, scratch_operands = 0 : i64, tpu.core_type = #tpu.core_type<tc>, window_params = [{transform_indices = @transform_0, window_bounds = array<i64: 4, 8, 32>}, {transform_indices = @transform_1, window_bounds = array<i64: 4, 8, 32>}, {transform_indices = @transform_2, window_bounds = array<i64: 4, 8, 32>}, {pipeline_mode = #tpu.pipeline_mode<synchronous>, transform_indices = @transform_3, window_bounds = array<i64: 32, 32>}, {pipeline_mode = #tpu.pipeline_mode<synchronous>, transform_indices = @transform_4, window_bounds = array<i64: 1, 32>}, {pipeline_mode = #tpu.pipeline_mode<synchronous>, transform_indices = @transform_5, window_bounds = array<i64: 32, 32>}, {pipeline_mode = #tpu.pipeline_mode<synchronous>, transform_indices = @transform_6, window_bounds = array<i64: 1, 32>}, {pipeline_mode = #tpu.pipeline_mode<synchronous>, transform_indices = @transform_7, window_bounds = array<i64: 32, 32>}, {pipeline_mode = #tpu.pipeline_mode<synchronous>, transform_indices = @transform_8, window_bounds = array<i64: 1, 32>}, {transform_indices = @transform_9, window_bounds = array<i64: 4, 8, 32>}]} {
    %c0 = arith.constant 0 : index
    %c0_0 = arith.constant 0 : index
    %c0_1 = arith.constant 0 : index
    %0 = vector.load %arg1[%c0, %c0_0, %c0_1] : memref<4x8x32xf32, #tpu.memory_space<vmem>>, vector<4x8x32xf32>
    %1 = vector.shape_cast %0 : vector<4x8x32xf32> to vector<32x32xf32>
    %c0_2 = arith.constant 0 : index
    %c0_3 = arith.constant 0 : index
    %c0_4 = arith.constant 0 : index
    %2 = vector.load %arg2[%c0_2, %c0_3, %c0_4] : memref<4x8x32xf32, #tpu.memory_space<vmem>>, vector<4x8x32xf32>
    %3 = vector.shape_cast %2 : vector<4x8x32xf32> to vector<32x32xf32>
    %c0_5 = arith.constant 0 : index
    %c0_6 = arith.constant 0 : index
    %c0_7 = arith.constant 0 : index
    %4 = vector.load %arg3[%c0_5, %c0_6, %c0_7] : memref<4x8x32xf32, #tpu.memory_space<vmem>>, vector<4x8x32xf32>
    %5 = vector.shape_cast %4 : vector<4x8x32xf32> to vector<32x32xf32>
    %c0_8 = arith.constant 0 : index
    %c0_9 = arith.constant 0 : index
    %6 = vector.load %arg4[%c0_8, %c0_9] : memref<32x32xf32, #tpu.memory_space<vmem>>, vector<32x32xf32>
    %cst = arith.constant dense<0.000000e+00> : vector<32x32xf32>
    %7 = tpu.matmul %1, %6, %cst {dimension_numbers = #tpu.dot_dimension_numbers<[1], [0], [0], [1], [0, 0, 1, 1], [], []>} : vector<32x32xf32>, vector<32x32xf32>, vector<32x32xf32> -> vector<32x32xf32>
    %c0_10 = arith.constant 0 : index
    %c0_11 = arith.constant 0 : index
    %8 = vector.load %arg5[%c0_10, %c0_11] : memref<1x32xf32, #tpu.memory_space<vmem>>, vector<1x32xf32>
    %9 = vector.broadcast %8 : vector<1x32xf32> to vector<32x32xf32>
    %10 = arith.addf %7, %9 : vector<32x32xf32>
    %cst_12 = arith.constant 0.176776692 : f32
    %11 = vector.broadcast %cst_12 : f32 to vector<32x32xf32>
    %12 = arith.mulf %10, %11 : vector<32x32xf32>
    %c0_13 = arith.constant 0 : index
    %c0_14 = arith.constant 0 : index
    %13 = vector.load %arg6[%c0_13, %c0_14] : memref<32x32xf32, #tpu.memory_space<vmem>>, vector<32x32xf32>
    %cst_15 = arith.constant dense<0.000000e+00> : vector<32x32xf32>
    %14 = tpu.matmul %3, %13, %cst_15 {dimension_numbers = #tpu.dot_dimension_numbers<[1], [0], [0], [1], [0, 0, 1, 1], [], []>} : vector<32x32xf32>, vector<32x32xf32>, vector<32x32xf32> -> vector<32x32xf32>
    %c0_16 = arith.constant 0 : index
    %c0_17 = arith.constant 0 : index
    %15 = vector.load %arg7[%c0_16, %c0_17] : memref<1x32xf32, #tpu.memory_space<vmem>>, vector<1x32xf32>
    %16 = vector.broadcast %15 : vector<1x32xf32> to vector<32x32xf32>
    %17 = arith.addf %14, %16 : vector<32x32xf32>
    %c0_18 = arith.constant 0 : index
    %c0_19 = arith.constant 0 : index
    %18 = vector.load %arg8[%c0_18, %c0_19] : memref<32x32xf32, #tpu.memory_space<vmem>>, vector<32x32xf32>
    %cst_20 = arith.constant dense<0.000000e+00> : vector<32x32xf32>
    %19 = tpu.matmul %5, %18, %cst_20 {dimension_numbers = #tpu.dot_dimension_numbers<[1], [0], [0], [1], [0, 0, 1, 1], [], []>} : vector<32x32xf32>, vector<32x32xf32>, vector<32x32xf32> -> vector<32x32xf32>
    %c0_21 = arith.constant 0 : index
    %c0_22 = arith.constant 0 : index
    %20 = vector.load %arg9[%c0_21, %c0_22] : memref<1x32xf32, #tpu.memory_space<vmem>>, vector<1x32xf32>
    %21 = vector.broadcast %20 : vector<1x32xf32> to vector<32x32xf32>
    %22 = arith.addf %19, %21 : vector<32x32xf32>
    %23 = vector.shape_cast %12 : vector<32x32xf32> to vector<4x8x32xf32>
    %24 = vector.shape_cast %17 : vector<32x32xf32> to vector<4x8x32xf32>
    %25 = vector.shape_cast %22 : vector<32x32xf32> to vector<4x8x32xf32>
    %26 = vector.extract_strided_slice %23 {offsets = [0, 0, 0], sizes = [4, 8, 16], strides = [1, 1, 1]} : vector<4x8x32xf32> to vector<4x8x16xf32>
    %27 = vector.extract_strided_slice %24 {offsets = [0, 0, 0], sizes = [4, 8, 16], strides = [1, 1, 1]} : vector<4x8x32xf32> to vector<4x8x16xf32>
    %28 = vector.extract_strided_slice %25 {offsets = [0, 0, 0], sizes = [4, 8, 16], strides = [1, 1, 1]} : vector<4x8x32xf32> to vector<4x8x16xf32>
    "tpu.trace_start"() <{level = 10 : i32, message = "bqd,bkd->bqk"}> : () -> ()
    %cst_23 = arith.constant dense<0.000000e+00> : vector<4x8x8xf32>
    %29 = tpu.matmul %26, %27, %cst_23 {dimension_numbers = #tpu.dot_dimension_numbers<[2], [2], [1], [1], [0, 0, 0, 1, 1, 1], [0], [0]>} : vector<4x8x16xf32>, vector<4x8x16xf32>, vector<4x8x8xf32> -> vector<4x8x8xf32>
    "tpu.trace_stop"() : () -> ()
    %cst_24 = arith.constant dense<0xFF800000> : vector<4x8xf32>
    %30 = vector.multi_reduction <maximumf>, %29, %cst_24 [2] : vector<4x8x8xf32> to vector<4x8xf32>
    %31 = vector.shape_cast %30 : vector<4x8xf32> to vector<4x8x1xf32>
    %32 = vector.broadcast %31 : vector<4x8x1xf32> to vector<4x8x8xf32>
    %33 = arith.subf %29, %32 : vector<4x8x8xf32>
    %34 = math.exp %33 : vector<4x8x8xf32>
    %cst_25 = arith.constant dense<0.000000e+00> : vector<4x8xf32>
    %35 = vector.multi_reduction <add>, %34, %cst_25 [2] : vector<4x8x8xf32> to vector<4x8xf32>
    %36 = vector.shape_cast %35 : vector<4x8xf32> to vector<4x8x1xf32>
    "tpu.trace_start"() <{level = 10 : i32, message = "bqk,bkd->bqd"}> : () -> ()
    %cst_26 = arith.constant dense<0.000000e+00> : vector<4x8x16xf32>
    %37 = tpu.matmul %34, %28, %cst_26 {dimension_numbers = #tpu.dot_dimension_numbers<[2], [1], [1], [2], [0, 0, 0, 1, 1, 2], [0], [0]>} : vector<4x8x8xf32>, vector<4x8x16xf32>, vector<4x8x16xf32> -> vector<4x8x16xf32>
    "tpu.trace_stop"() : () -> ()
    %38 = tpu.reciprocal %36 : vector<4x8x1xf32> -> vector<4x8x1xf32>
    %39 = vector.broadcast %38 : vector<4x8x1xf32> to vector<4x8x16xf32>
    %40 = arith.mulf %37, %39 : vector<4x8x16xf32>
    %41 = vector.extract_strided_slice %23 {offsets = [0, 0, 16], sizes = [4, 8, 16], strides = [1, 1, 1]} : vector<4x8x32xf32> to vector<4x8x16xf32>
    %42 = vector.extract_strided_slice %24 {offsets = [0, 0, 16], sizes = [4, 8, 16], strides = [1, 1, 1]} : vector<4x8x32xf32> to vector<4x8x16xf32>
    %43 = vector.extract_strided_slice %25 {offsets = [0, 0, 16], sizes = [4, 8, 16], strides = [1, 1, 1]} : vector<4x8x32xf32> to vector<4x8x16xf32>
    "tpu.trace_start"() <{level = 10 : i32, message = "bqd,bkd->bqk"}> : () -> ()
    %cst_27 = arith.constant dense<0.000000e+00> : vector<4x8x8xf32>
    %44 = tpu.matmul %41, %42, %cst_27 {dimension_numbers = #tpu.dot_dimension_numbers<[2], [2], [1], [1], [0, 0, 0, 1, 1, 1], [0], [0]>} : vector<4x8x16xf32>, vector<4x8x16xf32>, vector<4x8x8xf32> -> vector<4x8x8xf32>
    "tpu.trace_stop"() : () -> ()
    %cst_28 = arith.constant dense<0xFF800000> : vector<4x8xf32>
    %45 = vector.multi_reduction <maximumf>, %44, %cst_28 [2] : vector<4x8x8xf32> to vector<4x8xf32>
    %46 = vector.shape_cast %45 : vector<4x8xf32> to vector<4x8x1xf32>
    %47 = vector.broadcast %46 : vector<4x8x1xf32> to vector<4x8x8xf32>
    %48 = arith.subf %44, %47 : vector<4x8x8xf32>
    %49 = math.exp %48 : vector<4x8x8xf32>
    %cst_29 = arith.constant dense<0.000000e+00> : vector<4x8xf32>
    %50 = vector.multi_reduction <add>, %49, %cst_29 [2] : vector<4x8x8xf32> to vector<4x8xf32>
    %51 = vector.shape_cast %50 : vector<4x8xf32> to vector<4x8x1xf32>
    "tpu.trace_start"() <{level = 10 : i32, message = "bqk,bkd->bqd"}> : () -> ()
    %cst_30 = arith.constant dense<0.000000e+00> : vector<4x8x16xf32>
    %52 = tpu.matmul %49, %43, %cst_30 {dimension_numbers = #tpu.dot_dimension_numbers<[2], [1], [1], [2], [0, 0, 0, 1, 1, 2], [0], [0]>} : vector<4x8x8xf32>, vector<4x8x16xf32>, vector<4x8x16xf32> -> vector<4x8x16xf32>
    "tpu.trace_stop"() : () -> ()
    %53 = tpu.reciprocal %51 : vector<4x8x1xf32> -> vector<4x8x1xf32>
    %54 = vector.broadcast %53 : vector<4x8x1xf32> to vector<4x8x16xf32>
    %55 = arith.mulf %52, %54 : vector<4x8x16xf32>
    %56 = tpu.concatenate %40, %55 in 2 : vector<4x8x16xf32>, vector<4x8x16xf32> -> vector<4x8x32xf32>
    %c0_31 = arith.constant 0 : index
    %c0_32 = arith.constant 0 : index
    %c0_33 = arith.constant 0 : index
    %57 = vector.load %arg10[%c0_31, %c0_32, %c0_33] : memref<4x8x32xf32, #tpu.memory_space<vmem>>, vector<4x8x32xf32>
    tpu.vector_store %arg10[%c0_31, %c0_32, %c0_33], %56 {strides = array<i32>} : memref<4x8x32xf32, #tpu.memory_space<vmem>>, vector<4x8x32xf32>,
    return
  }
  func.func @transform_0(%arg0: i32) -> (i32, i32, i32) {
    %c0_i32 = arith.constant 0 : i32
    %c0_i32_0 = arith.constant 0 : i32
    %c0_i32_1 = arith.constant 0 : i32
    return %arg0, %c0_i32, %c0_i32_0 : i32, i32, i32
  }
  func.func @transform_1(%arg0: i32) -> (i32, i32, i32) {
    %c0_i32 = arith.constant 0 : i32
    %c0_i32_0 = arith.constant 0 : i32
    %c0_i32_1 = arith.constant 0 : i32
    return %arg0, %c0_i32, %c0_i32_0 : i32, i32, i32
  }
  func.func @transform_2(%arg0: i32) -> (i32, i32, i32) {
    %c0_i32 = arith.constant 0 : i32
    %c0_i32_0 = arith.constant 0 : i32
    %c0_i32_1 = arith.constant 0 : i32
    return %arg0, %c0_i32, %c0_i32_0 : i32, i32, i32
  }
  func.func @transform_3(%arg0: i32) -> (i32, i32) {
    %c0_i32 = arith.constant 0 : i32
    %c0_i32_0 = arith.constant 0 : i32
    %c0_i32_1 = arith.constant 0 : i32
    return %c0_i32, %c0_i32_0 : i32, i32
  }
  func.func @transform_4(%arg0: i32) -> (i32, i32) {
    %c0_i32 = arith.constant 0 : i32
    %c0_i32_0 = arith.constant 0 : i32
    %c0_i32_1 = arith.constant 0 : i32
    return %c0_i32, %c0_i32_0 : i32, i32
  }
  func.func @transform_5(%arg0: i32) -> (i32, i32) {
    %c0_i32 = arith.constant 0 : i32
    %c0_i32_0 = arith.constant 0 : i32
    %c0_i32_1 = arith.constant 0 : i32
    return %c0_i32, %c0_i32_0 : i32, i32
  }
  func.func @transform_6(%arg0: i32) -> (i32, i32) {
    %c0_i32 = arith.constant 0 : i32
    %c0_i32_0 = arith.constant 0 : i32
    %c0_i32_1 = arith.constant 0 : i32
    return %c0_i32, %c0_i32_0 : i32, i32
  }
  func.func @transform_7(%arg0: i32) -> (i32, i32) {
    %c0_i32 = arith.constant 0 : i32
    %c0_i32_0 = arith.constant 0 : i32
    %c0_i32_1 = arith.constant 0 : i32
    return %c0_i32, %c0_i32_0 : i32, i32
  }
  func.func @transform_8(%arg0: i32) -> (i32, i32) {
    %c0_i32 = arith.constant 0 : i32
    %c0_i32_0 = arith.constant 0 : i32
    %c0_i32_1 = arith.constant 0 : i32
    return %c0_i32, %c0_i32_0 : i32, i32
  }
  func.func @transform_9(%arg0: i32) -> (i32, i32, i32) {
    %c0_i32 = arith.constant 0 : i32
    %c0_i32_0 = arith.constant 0 : i32
    %c0_i32_1 = arith.constant 0 : i32
    return %arg0, %c0_i32, %c0_i32_0 : i32, i32, i32
  }
}

</mosaic_0001>

<bundles_post_ra>
// kernel: tpu_custom_call.1
= control target key start
LH: loop header
LB: loop body
LE: loop exit
PB: predicated region body
PF: predicated region fallthrough
CT: control target
= control target key end

     0   :  { %s3485_s0 = inlined_call_operand.hbm [shape: f32[8,8,32], index: 0, kind: input, shape index: {}]   ;;  %s3486_s1 = inlined_call_operand.hbm [shape: f32[8,8,32], index: 1, kind: input, shape index: {}]   ;;  %s3487_s2 = inlined_call_operand.hbm [shape: f32[8,8,32], index: 2, kind: input, shape index: {}]   ;;  %s3488_s3 = inlined_call_operand.hbm [shape: f32[32,32], index: 3, kind: input, shape index: {}]   ;;  %s3489_s4 = inlined_call_operand.vmem [shape: f32[1,32], index: 4, kind: input, shape index: {}]   ;;  %s3490_s5 = inlined_call_operand.hbm [shape: f32[32,32], index: 5, kind: input, shape index: {}]   ;;  %s3491_s6 = inlined_call_operand.vmem [shape: f32[1,32], index: 6, kind: input, shape index: {}]   ;;  %s3492_s7 = inlined_call_operand.hbm [shape: f32[32,32], index: 7, kind: input, shape index: {}]   ;;  %s3493_s8 = inlined_call_operand.vmem [shape: f32[1,32], index: 8, kind: input, shape index: {}]   ;;  %s3494_s9 = inlined_call_operand.hbm [shape: f32[8,8,32], index: 9, kind: output, shape index: {}]  }
   0x1   :  { %3513 = sst [smem:[#allocation24_spill]] %s3486_s1 }
   0x2   :  { %3514 = sst [smem:[#allocation25_spill]] %s3488_s3 }
   0x3   :  { %3515 = sst [smem:[#allocation26_spill]] %s3490_s5 }
   0x4   :  { %3516 = sst [smem:[#allocation27_spill]] %s3492_s7 }
   0x5   :  { %3517 = sst [smem:[#allocation28_spill]] %s3494_s9 }
   0x6   :  { %14 = vsyncpa [#allocation3], 0 }
   0x7   :  { %16 = vsyncpa [#allocation3 + $0x1], 0 }
   0x8   :  { %17 = vsyncpa [#allocation6], 0 }
   0x9   :  { %19 = vsyncpa [#allocation6 + $0x1], 0 }
   0xa   :  { %20 = vsyncpa [#allocation9], 0 }
   0xb   :  { %21 = vsyncpa [#allocation12], 0 }
   0xc   :  { %22 = vsyncpa [#allocation4], 0 }
   0xd   :  { %24 = vsyncpa [#allocation4 + $0x1], 0  ;;  %s2987_s30 = smov 0   ;;  %s2989_s10 = smov 0  }
   0xe   :  { %s2991_s11 = smov 0   ;;  %s2993_s12 = smov 0  }
   0xf LB: > { %3518 = sst [smem:[#allocation19_spill]] %s2908_s30  ;;  %s3008_s13 = sadd.s32 4294967295, %s2920_s12   ;;  %s2920_s12 = sphi %s2993_s12, %s3555_s12   ;;  %s2916_s11 = sphi %s2991_s11, %s3559_s11   ;;  %s2912_s10 = sphi %s2989_s10, %s3558_s10   ;;  %s2908_s30 = sphi %s2987_s30, %s3557_s30  }
  0x10   : > { %3519 = sst [smem:[#allocation20_spill]] %s2920_s12  ;;  %s2306_s14 = sadd.s32 4294967294, %s2920_s12  }
  0x11   : > { %s3012_s15 = sadd.s32 1, %s2920_s12   ;;  %s37_s16 = sadd.s32 1, %s2916_s11 }
  0x12   : > { %3520 = sst [smem:[#allocation21_spill]] %s3012_s15  ;;  %s34_s17 = ssub.s32 %s2920_s12, %s3012_s15 }
  0x13   : > { %p44_p0 = scmp.ne.s32.totalorder %s2916_s11, %s2912_s10  ;;  %p35_p1 = scmp.eq.s32.totalorder %s34_s17, 0 }
  0x14   : > { %p45_p2 = scmp.eq.s32.totalorder %s2920_s12, 0  ;;  %p50_p3 = scmp.ne.s32.totalorder %s2912_s10, %s2908_s30 }
  0x15   : > { %p3495_p4 = scmp.eq.s32.totalorder %s3008_s13, 0  ;;  %p252_p7 = scmp.eq.s32.totalorder %s3008_s13, 1 }
  0x16   : > { %s3024_s18 = scalar_select %p35_p1, %s2916_s11, %s37_s16  }
  0x17   : > { %p3026_p5 = por %p45_p2, %p44_p0  ;;  %p3032_p6 = por %p3495_p4, %p50_p3 }
  0x18   : > { %3521 = sst [smem:[#allocation22_spill]] %s3024_s18  ;;  %p258_p8 = scmp.eq.s32.totalorder %s2306_s14, 1 }
  0x19   : > { %s3523_s20 = scalar_select %p3032_p6, 1, 0 }
  0x1a   : > { %p2307_p9 = scmp.ge.s32.totalorder %s2920_s12, 1  ;;  %p265_p10 = scmp.lt.s32.totalorder %s2920_s12, 3 }
  0x1b   : > { %p3039_p11 = por %p252_p7, %p44_p0  ;;  %p3043_p12 = por %p258_p8, %p50_p3 }
  0x1c   : > { %p3047_p13 = pnand %p2307_p9, %p265_p10  ;;  %s2922_s24 = smov [#allocation8]  }
  0x1d   : > { %s3524_s21 = scalar_select %p3039_p11, 1, 0 }
  0x1e   : > { %s3525_s22 = scalar_select %p3043_p12, 1, 0 }
  0x1f   : > { %s3527_s23 = scalar_select %p3047_p13, 1, 0 }
  0x20   : > { %3526 = sst [smem:[#allocation23_spill]] %s3525_s22  ;;  %p2575_p1 = pneg %p3047_p13 }
  0x21   : > { %s277_s25 = sshll.u32 %s2922_s24, 4  ;;  %p2602_p3 = scmp.lt.s32.totalorder %s2920_s12, 2  ;;  %s278_s25 = int_to_ptr.vmem [resolvable:$true] %s277_s25 }
  0x22   : > { %p3055_p2 = pnand %p2575_p1, %p3495_p4  ;;  %s3497_s27 = sand.u32 1, %s2916_s11  }
  0x23   : > { %s3064_s28 = sshll.u32 %s3497_s27, 5  ;;  %s2693_s29 = scalar_lea.vmem %s278_s25, 512 }
  0x24   : > { %s3528_s26 = scalar_select %p3055_p2, 1, 0 }
  0x25   : > { %p3507_p7 = pneg %p3055_p2  ;;  %p2694_p8 = scmp.ne.s32.totalorder %s278_s25, %s2693_s29 }
  0x26   : > { %p2701_p1 = scmp.lt.s32.totalorder %s278_s25, %s278_s25  ;;  %p2702_p4 = scmp.lt.s32.totalorder %s2693_s29, %s2693_s29 }
  0x27   : > { %p2696_p9 = pnand %p2694_p8, %p3507_p7 }
  0x28   : > { %p2703_p12 = por %p2702_p4, %p2701_p1 }
  0x29   : > { %p2697_p10 = pneg %p2696_p9 }
  0x2b   : > { %p2704_p11 = pnand %p2703_p12, %p2697_p10 }
  0x2d   : > { %2707 = shalt.err (!%p2704_p11)
}
  0x2e   : > { %s3502_s14 = smov 128   ;;  %s3504_s16 = smov 8  }
  0x2f   : > { %s3529_s3 = sld [smem:[#allocation25_spill]]  ;;  %s3080_s29 = sshll.u32 %s2920_s12, 9 }
  0x30   : > { %p3086_p4 = pnand %p2602_p3, %p3026_p5  ;;  %s347_s18 = sand.u32 1, %s2920_s12  }
  0x31   : > { %s3531_s1 = sld [smem:[#allocation24_spill]]  ;;  %s3100_s19 = scalar_lea.sflag [#allocation6], %s347_s18 }
  0x32   : > { %p3106_p11 = pneg %p3086_p4 }
  0x35   : > { %2578 = dma.hbm_to_vmem [thread:$0]  (!%p3055_p2), %s3529_s3, 512, %s278_s25, [#allocation9], %s3502_s14, %s3502_s14, %s3504_s16  }
  0x36   : > { %s351_s25 = scalar_lea.vmem [#allocation5], %s3064_s28 }
  0x37   : > { %s3095_s30 = scalar_lea.hbm %s3531_s1, %s3080_s29  ;;  %s358_s17 = sshll.u32 %s351_s25, 4  ;;  %s3098_s17 = int_to_ptr.vmem [resolvable:$true] %s358_s17 }
  0x38   : > { %s2708_s24 = scalar_lea.hbm %s3095_s30, 512  ;;  %s2713_s16 = scalar_lea.hbm %s3531_s1, 1024 }
  0x39   : > { %p2709_p5 = scmp.ne.s32.totalorder %s3095_s30, %s2708_s24  ;;  %p2714_p8 = scmp.lt.s32.totalorder %s3095_s30, %s3531_s1 }
  0x3a   : > { %p2715_p9 = scmp.lt.s32.totalorder %s2713_s16, %s2708_s24 }
  0x3b   : > { %p2711_p12 = pnand %p3106_p11, %p2709_p5 }
  0x3c   : > { %p2716_p10 = por %p2715_p9, %p2714_p8 }
  0x3d   : > { %p2712_p3 = pneg %p2711_p12 }
  0x3f   : > { %p2717_p1 = pnand %p2716_p10, %p2712_p3 }
  0x41   : > { %2720 = shalt.err (!%p2717_p1)
}
  0x42   : > { %s2721_s18 = scalar_lea.vmem %s3098_s17, 512  ;;  %s2925_s12 = smov [#allocation5]  }
  0x43   : > { %p2722_p0 = scmp.ne.s32.totalorder %s3098_s17, %s2721_s18  ;;  %s2726_s15 = sshll.u32 %s2925_s12, 4  ;;  %s2727_s15 = int_to_ptr.vmem [resolvable:$false] %s2726_s15 }
  0x44   : > { %s2728_s22 = scalar_lea.vmem %s2727_s15, 1024  ;;  %p2729_p7 = scmp.lt.s32.totalorder %s3098_s17, %s2727_s15 }
  0x45   : > { %p2724_p5 = pnand %p2722_p0, %p3106_p11  ;;  %p2730_p6 = scmp.lt.s32.totalorder %s2728_s22, %s2721_s18 }
  0x47   : > { %p2725_p12 = pneg %p2724_p5  ;;  %p2731_p13 = por %p2730_p6, %p2729_p7 }
  0x49   : > { %p2732_p2 = pnand %p2731_p13, %p2725_p12 }
  0x4b   : > { %2735 = shalt.err (!%p2732_p2)
}
  0x4c   : > { %s3533_s3 = smov 8   ;;  %s3534_s16 = smov 128  }
  0x4d   : > { %2591 = dma.hbm_to_vmem [thread:$0]  (!%p3086_p4), %s3095_s30, 512, %s3098_s17, %s3100_s19, %s3534_s16, %s3534_s16, %s3533_s3  }
  0x4e   : > { %s2926_s24 = smov [#allocation10]   ;;  %s2927_s12 = smov [#allocation11]  }
  0x4f   : > { %s293_s25 = sshll.u32 %s2926_s24, 4  ;;  %s309_s1 = sshll.u32 %s2927_s12, 4  ;;  %s294_s25 = int_to_ptr.vmem [resolvable:$true] %s293_s25  ;;  %s310_s1 = int_to_ptr.vmem [resolvable:$true] %s309_s1 }
  0x50   : > { %s2747_s15 = scalar_lea.vmem %s294_s25, 512  ;;  %p3535_p6 = scmp.ne.s32.totalorder %s3528_s26, 0 }
  0x51   : > { %p2748_p0 = scmp.ne.s32.totalorder %s294_s25, %s2747_s15  ;;  %p2755_p3 = scmp.lt.s32.totalorder %s294_s25, %s294_s25 }
  0x52   : > { %p3536_p13 = pneg %p3535_p6  ;;  %p2756_p8 = scmp.lt.s32.totalorder %s2747_s15, %s2747_s15 }
  0x54   : > { %p2750_p2 = pnand %p2748_p0, %p3536_p13  ;;  %p2757_p9 = por %p2756_p8, %p2755_p3 }
  0x56   : > { %p2751_p7 = pneg %p2750_p2 }
  0x58   : > { %p2758_p10 = pnand %p2757_p9, %p2751_p7 }
  0x5a   : > { %2761 = shalt.err (!%p2758_p10)
}
  0x5b   : > { %s3537_s5 = sld [smem:[#allocation26_spill]]  ;;  %s2773_s18 = scalar_lea.vmem %s310_s1, 512 }
  0x5c   : > { %p2774_p1 = scmp.ne.s32.totalorder %s310_s1, %s2773_s18  ;;  %p3538_p5 = pmov %p3536_p13 }
  0x5d   : > { %p2781_p13 = scmp.lt.s32.totalorder %s310_s1, %s310_s1  ;;  %p2782_p2 = scmp.lt.s32.totalorder %s2773_s18, %s2773_s18 }
  0x5e   : > { %p2776_p12 = pnand %p2774_p1, %p3538_p5 }
  0x5f   : > { %p2783_p7 = por %p2782_p2, %p2781_p13 }
  0x60   : > { %p2777_p0 = pneg %p2776_p12 }
  0x61   : > { %2581 = dma.hbm_to_vmem [thread:$0]  (!%p3535_p6), %s3537_s5, 512, %s294_s25, [#allocation9], %s3534_s16, %s3534_s16, %s3533_s3  }
  0x62   : > { %p2784_p3 = pnand %p2783_p7, %p2777_p0 }
  0x64   : > { %2787 = shalt.err (!%p2784_p3)
}
  0x65   : > { %s3539_s7 = sld [smem:[#allocation27_spill]]  ;;  %s3158_s15 = scalar_lea.hbm %s3485_s0, %s3080_s29 }
  0x66   : > { %s330_s26 = scalar_lea.vmem [#allocation2], %s3064_s28  ;;  %s3167_s22 = scalar_lea.hbm %s3487_s2, %s3080_s29 }
  0x67   : > { %s337_s30 = sshll.u32 %s330_s26, 4  ;;  %s3540_s24 = sand.u32 1, %s2916_s11   ;;  %s3161_s30 = int_to_ptr.vmem [resolvable:$true] %s337_s30 }
  0x68   : > { %s327_s5 = scalar_lea.sflag [#allocation3], %s3540_s24  ;;  %p2794_p10 = scmp.lt.s32.totalorder %s3158_s15, %s3485_s0 }
  0x6b   : > { %2584 = dma.hbm_to_vmem [thread:$0]  (!%p3535_p6), %s3539_s7, 512, %s310_s1, [#allocation12], %s3534_s16, %s3534_s16, %s3533_s3  }
  0x6c   : > { %s2788_s1 = scalar_lea.hbm %s3158_s15, 512  ;;  %s2793_s7 = scalar_lea.hbm %s3485_s0, 1024 }
  0x6d   : > { %p2789_p6 = scmp.ne.s32.totalorder %s3158_s15, %s2788_s1  ;;  %p2795_p1 = scmp.lt.s32.totalorder %s2793_s7, %s2788_s1 }
  0x6f   : > { %p2791_p8 = pnand %p2789_p6, %p3106_p11  ;;  %p2796_p5 = por %p2795_p1, %p2794_p10 }
  0x71   : > { %p2792_p9 = pneg %p2791_p8 }
  0x73   : > { %p2797_p12 = pnand %p2796_p5, %p2792_p9 }
  0x75   : > { %2800 = shalt.err (!%p2797_p12)
}
  0x76   : > { %s2801_s29 = scalar_lea.vmem %s3161_s30, 512  ;;  %s2928_s17 = smov [#allocation2]  }
  0x77   : > { %p2802_p0 = scmp.ne.s32.totalorder %s3161_s30, %s2801_s29  ;;  %s2806_s18 = sshll.u32 %s2928_s17, 4  ;;  %s2807_s18 = int_to_ptr.vmem [resolvable:$false] %s2806_s18 }
  0x78   : > { %s2808_s24 = scalar_lea.vmem %s2807_s18, 1024  ;;  %p2809_p7 = scmp.lt.s32.totalorder %s3161_s30, %s2807_s18 }
  0x79   : > { %p2804_p13 = pnand %p2802_p0, %p3106_p11  ;;  %p2810_p3 = scmp.lt.s32.totalorder %s2808_s24, %s2801_s29 }
  0x7b   : > { %p2805_p2 = pneg %p2804_p13  ;;  %p2811_p6 = por %p2810_p3, %p2809_p7 }
  0x7d   : > { %p2812_p8 = pnand %p2811_p6, %p2805_p2 }
  0x7f   : > { %2815 = shalt.err (!%p2812_p8)
}
  0x80   : > { %2588 = dma.hbm_to_vmem [thread:$0]  (!%p3086_p4), %s3158_s15, 512, %s3161_s30, %s327_s5, %s3534_s16, %s3534_s16, %s3533_s3  }
  0x81   : > { %s372_s7 = scalar_lea.vmem [#allocation7], %s3064_s28  ;;  %s2816_s1 = scalar_lea.hbm %s3167_s22, 512 }
  0x82   : > { %s379_s9 = sshll.u32 %s372_s7, 4  ;;  %p2817_p9 = scmp.ne.s32.totalorder %s3167_s22, %s2816_s1  ;;  %s380_s9 = int_to_ptr.vmem [resolvable:$true] %s379_s9 }
  0x83   : > { %s2821_s26 = scalar_lea.hbm %s3487_s2, 1024  ;;  %p2822_p5 = scmp.lt.s32.totalorder %s3167_s22, %s3487_s2 }
  0x84   : > { %p2819_p10 = pnand %p2817_p9, %p3106_p11  ;;  %p2823_p12 = scmp.lt.s32.totalorder %s2821_s26, %s2816_s1 }
  0x86   : > { %p2820_p1 = pneg %p2819_p10  ;;  %p2824_p0 = por %p2823_p12, %p2822_p5 }
  0x88   : > { %p2825_p13 = pnand %p2824_p0, %p2820_p1 }
  0x8a   : > { %2828 = shalt.err (!%p2825_p13)
}
  0x8b   : > { %s2829_s5 = scalar_lea.vmem %s380_s9, 512  ;;  %s2929_s28 = smov [#allocation7]  }
  0x8c   : > { %p2830_p2 = scmp.ne.s32.totalorder %s380_s9, %s2829_s5  ;;  %s2834_s15 = sshll.u32 %s2929_s28, 4  ;;  %s2835_s15 = int_to_ptr.vmem [resolvable:$false] %s2834_s15 }
  0x8d   : > { %s2836_s30 = scalar_lea.vmem %s2835_s15, 1024  ;;  %p2837_p6 = scmp.lt.s32.totalorder %s380_s9, %s2835_s15 }
  0x8e   : > { %p2832_p7 = pnand %p2830_p2, %p3106_p11  ;;  %p2838_p8 = scmp.lt.s32.totalorder %s2836_s30, %s2829_s5 }
  0x90   : > { %p2833_p3 = pneg %p2832_p7  ;;  %p2839_p9 = por %p2838_p8, %p2837_p6 }
  0x92   : > { %p2840_p10 = pnand %p2839_p9, %p2833_p3 }
  0x94   : > { %2843 = shalt.err (!%p2840_p10)
}
  0x95   : > { %2594 = dma.hbm_to_vmem [thread:$0]  (!%p3086_p4), %s3167_s22, 512, %s380_s9, %s3100_s19, %s3534_s16, %s3534_s16, %s3533_s3  }
  0x96   : > { %p3541_p11 = scmp.ne.s32.totalorder %s3527_s23, 0 }
  0x97   : > { %s3218_s14 = sand.u32 (!%p3541_p11), 1, %s2912_s10   ;;  %p3542_p1 = scmp.ne.s32.totalorder (!%p3541_p11), %s3523_s20, 0 }
  0x98   : > { %391 = sbr.rel (%p3541_p11) target bundleno = 1424 (0x590), region = 56  ;;  %s3221_s18 = sshll.u32 (!%p3541_p11), %s3218_s14, 5 }
  0x99   : > { %s394_s24 = scalar_lea.sflag (!%p3541_p11), [#allocation3], %s3218_s14  ;;  %s3225_s27 = scalar_lea.vmem (!%p3541_p11), [#allocation2], %s3221_s18 }
  0x9d   : > { %2887 = dma.done.wait (%p3542_p1), %s394_s24, 512  }
  0x9e   : > { %2889 = vsyncadd (%p3542_p1), %s394_s24, 4294966784  ;;  %s402_s23 = sand.u32 1, %s3008_s13   ;;  %s3233_s3 = scalar_lea.vmem [#allocation5], %s3221_s18 }
  0x9f   : > { %s403_s19 = scalar_lea.sflag [#allocation6], %s402_s23 }
  0xa0   : > { %2891 = dma.done.wait (%p3542_p1), %s403_s19, 1024  }
  0xa1   : > { %2893 = vsyncadd (%p3542_p1), %s403_s19, 4294966272  ;;  %s3240_s16 = scalar_lea.vmem [#allocation7], %s3221_s18  ;;  %p3543_p4 = scmp.eq.s32.totalorder %s3008_s13, 0 }
  0xa3   : > { %2895 = dma.done.wait (%p3543_p4), [#allocation9], 1024   ;;  %p3544_p5 = pmov %p3543_p4 }
  0xa4   : > { %p3545_p12 = pmov %p3543_p4 }
  0xa5   : > { %2897 = vsyncadd (%p3544_p5), [#allocation9], 4294966272 }
  0xa6   : > { %2899 = dma.done.wait (%p3545_p12), [#allocation12], 512   ;;  %p3546_p0 = pmov %p3543_p4 }
  0xa7   : > { %v491_v0 = vld [vmem:[#allocation8 + $0x18] sm:$0xff]  ;;  %v490_v2 = vld [vmem:[#allocation8 + $0x10] sm:$0xff]  ;;  %v489_v4 = vld [vmem:[#allocation8 + $0x8] sm:$0xff]  ;;  %vm499_vm0 = vcmask 261120   ;;  %v2930_v22 = vmov 0.0   ;;  %vm2931_vm1 = vmmov 0  }
  0xa8   : > { %2901 = vsyncadd (%p3546_p0), [#allocation12], 4294966784  ;;  %v604_v1 = vld [vmem:[#allocation10 + $0x18] sm:$0xff]  ;;  %2433 = vmatprep.subr.mxu0 %v491_v0  ;;  %v603_v3 = vld [vmem:[#allocation10 + $0x10] sm:$0xff]  ;;  %vm817_vm2 = vcmask 130048   ;;  %s2932_s1 = smov 112  }
  0xa9   : > { %2447 = vmatprep.subr.mxu1 %v604_v1  ;;  %2434 = vmatpush3.msra.mxu0 %v491_v0  ;;  %v602_v5 = vld [vmem:[#allocation10 + $0x8] sm:$0xff]  ;;  %v488_v6 = vld [vmem:[#allocation8] sm:$0xff]  ;;  %v482_v12 = vld [vmem:[%s3233_s3 + $0x10] sm:$0xff]  ;;  %vm1122_vm3 = vcmask 64512   ;;  %s2933_s26 = smov 16   ;;  %s471_s29 = scalar_lea.vmem [#allocation13], %s3221_s18 }
  0xaa   : > { %2448 = vmatpush3.msra.mxu1 %v604_v1  ;;  %2435 = vmatprep.subr.mxu0 %v490_v2  ;;  %v601_v7 = vld [vmem:[#allocation10] sm:$0xff]  ;;  %v477_v10 = vld [vmem:[%s3225_s27 + $0x8] sm:$0xff]  ;;  %v478_v13 = vld [vmem:[%s3225_s27 + $0x10] sm:$0xff]  ;;  %s2161_s17 = sshll.u32 %s471_s29, 4  ;;  %s2376_s5 = sshll.u32 %s3008_s13, 9  ;;  %s3433_s17 = int_to_ptr.vmem [resolvable:$true] %s2161_s17 }
  0xab   : > { %2449 = vmatprep.subr.mxu1 %v603_v3  ;;  %2436 = vmatpush3.msra.mxu0 %v490_v2  ;;  %v476_v8 = vld [vmem:[%s3225_s27] sm:$0xff]  ;;  %v481_v11 = vld [vmem:[%s3233_s3 + $0x8] sm:$0xff]  ;;  %v712_v14 = vld [vmem:[#allocation11 + $0x18] sm:$0xff]  ;;  %s3547_s30 = sld [smem:[#allocation28_spill]]  ;;  %s2148_s13 = scalar_lea.sflag [#allocation4], %s3218_s14 }
  0xac   : > { %2450 = vmatpush3.msra.mxu1 %v603_v3  ;;  %2437 = vmatprep.subr.mxu0 %v489_v4  ;;  %v480_v9 = vld [vmem:[%s3233_s3] sm:$0xff]  ;;  %v483_v15 = vld [vmem:[%s3233_s3 + $0x18] sm:$0xff]  ;;  %v711_v17 = vld [vmem:[#allocation11 + $0x10] sm:$0xff]  ;;  %p3549_p2 = scmp.ne.s32.totalorder %s3524_s21, 0  ;;  %s2934_s23 = smov [#allocation13]  }
  0xad   : > { %2451 = vmatprep.subr.mxu1 %v602_v5  ;;  %2438 = vmatpush3.msra.mxu0 %v489_v4  ;;  %v479_v16 = vld [vmem:[%s3225_s27 + $0x18] sm:$0xff]  ;;  %v710_v18 = vld [vmem:[#allocation11 + $0x8] sm:$0xff]  ;;  %v709_v19 = vld [vmem:[#allocation11] sm:$0xff]  ;;  %s2844_s27 = scalar_lea.vmem %s3433_s17, 512  ;;  %s2848_s19 = sshll.u32 %s2934_s23, 4  ;;  %s2849_s19 = int_to_ptr.vmem [resolvable:$false] %s2848_s19 }
  0xae   : > { %2452 = vmatpush3.msra.mxu1 %v602_v5  ;;  %2439 = vmatprep.subr.mxu0 %v488_v6  ;;  %v484_v20 = vld [vmem:[%s3240_s16] sm:$0xff]  ;;  %v485_v21 = vld [vmem:[%s3240_s16 + $0x8] sm:$0xff]  ;;  %v486_v23 = vld [vmem:[%s3240_s16 + $0x10] sm:$0xff]  ;;  %p2845_p13 = scmp.ne.s32.totalorder %s3433_s17, %s2844_s27  ;;  %s2850_s3 = scalar_lea.vmem %s2849_s19, 1024 }
  0xaf   : > { %2453 = vmatprep.subr.mxu1 %v601_v7  ;;  %2440 = vmatpush3.msra.mxu0 %v488_v6  ;;  %v487_v24 = vld [vmem:[%s3240_s16 + $0x18] sm:$0xff]  ;;  %v2334_v25 = vld [vmem:[%s3491_s6] ss:$0 sm:$0xff]  ;;  %p2851_p6 = scmp.lt.s32.totalorder %s3433_s17, %s2849_s19  ;;  %p2852_p8 = scmp.lt.s32.totalorder %s2850_s3, %s2844_s27 }
  0xb0   : > { %2441 = vmatprep.mubr.msk.f32.mxu0 %vm499_vm0, %v476_v8  ;;  %2454 = vmatpush3.msra.mxu1 %v601_v7  ;;  %v2329_v27 = vld [vmem:[%s3489_s4] ss:$0 sm:$0xff]  ;;  %p2846_p7 = pnand %p2845_p13, %p3549_p2 }
  0xb1   : > { %2455 = vmatprep.mubr.msk.f32.mxu1 %vm499_vm0, %v480_v9  ;;  %2442 = vmatmul.mubr.msk.f32.vlgmr.msra.gmra.mxu0 %vm499_vm0, %v477_v10  ;;  %v2339_v47 = vld [vmem:[%s3493_s8] ss:$0 sm:$0xff]  ;;  %s3548_s18 = smov %s3547_s30  ;;  %s3440_s24 = scalar_lea.hbm %s3547_s30, %s2376_s5 }
  0xb2   : > { %2456 = vmatmul.mubr.msk.f32.vlgmr.msra.gmra.mxu1 %vm499_vm0, %v481_v11  ;;  %2444 = vmatprep.mubr.msk.f32.mxu0 %vm499_vm0, %v478_v13  ;;  %p2847_p3 = pneg %p2846_p7  ;;  %p2853_p9 = por %p2852_p8, %p2851_p6 }
  0xb3   : > { %2458 = vmatprep.mubr.msk.f32.mxu1 %vm499_vm0, %v482_v12  ;;  %2461 = vmatprep.subr.mxu0 %v712_v14 }
  0xb4   : > { %2462 = vmatpush3.msra.mxu0 %v712_v14  ;;  %2475 = vmatprep.subr.mxu1 %v2930_v22  ;;  %p2854_p10 = pnand %p2853_p9, %p2847_p3 }
  0xb5   : > { %2445 = vmatmul.mubr.msk.f32.gmra.mxu0 %vm499_vm0, %v479_v16  ;;  %2463 = vmatprep.subr.mxu0 %v711_v17 }
  0xb6   : > { %2459 = vmatmul.mubr.msk.f32.gmra.mxu1 %vm499_vm0, %v483_v15  ;;  %2464 = vmatpush3.msra.mxu0 %v711_v17 }
  0xb7   : > { %2465 = vmatprep.subr.mxu0 %v710_v18  ;;  %2469 = vmatprep.mubr.msk.f32.mxu0 %vm499_vm0, %v484_v20 }
  0xb8   : > { %2466 = vmatpush3.msra.mxu0 %v710_v18  ;;  %2477 = vmatprep.mubr.msk.f32.mxu1 %vm2931_vm1, %v2930_v22 }
  0xb9   : > { %2467 = vmatprep.subr.mxu0 %v709_v19 }
  0xba   : > { %2468 = vmatpush3.msra.mxu0 %v709_v19 }
  0xbb   : > { %2470 = vmatmul.mubr.msk.f32.vlgmr.msra.gmra.mxu0 %vm499_vm0, %v485_v21  ;;  %2485 = vmatprep.subr.mxu0 %v2930_v22 }
  0xbc   : > { %2472 = vmatprep.mubr.msk.f32.mxu0 %vm499_vm0, %v486_v23 }
  0xbf   : > { %2473 = vmatmul.mubr.msk.f32.gmra.mxu0 %vm499_vm0, %v487_v24 }
  0xc0   : > { %2487 = vmatprep.mubr.msk.f32.mxu0 %vm2931_vm1, %v2930_v22 }
 0x171   : > { %v2443_v26 = vpop.f32.mrf.mxu0 }
 0x172   : > { %v2457_v28 = vpop.f32.mrf.mxu1  ;;  %v584_v36 = vadd.f32 %v2443_v26, %v2329_v27 }
 0x173   : > { %v696_v29 = vadd.f32 %v2457_v28, %v2334_v25  ;;  %v578_v30 = vpop.f32.mrf.mxu0 }
 0x174   : > { %v690_v31 = vpop.f32.mrf.mxu1  ;;  %v579_v32 = vadd.f32 %v2329_v27, %v578_v30  ;;  %v598_v42 = vmul.f32 0.17677669, %v584_v36 }
 0x175   : > { %v3286_v33 = vadd.f32 %v2334_v25, %v690_v31  ;;  %1539 = vrot.lane.b32.xlu1 %v696_v29, %s2932_s1  ;;  %v2446_v35 = vpop.f32.mrf.mxu0 }
 0x176   : > { %v2460_v34 = vpop.f32.mrf.mxu1  ;;  %v597_v37 = vmul.f32 0.17677669, %v579_v32  ;;  %v594_v44 = vadd.f32 %v2446_v35, %v2329_v27 }
 0x177   : > { %2476 = vmatpush3.xpose.msk.msra.mxu1 %vm817_vm2, %v3286_v33  ;;  %v588_v39 = vpop.f32.mrf.mxu0  ;;  %v706_v45 = vadd.f32 %v2460_v34, %v2334_v25 }
 0x178   : > { %v700_v38 = vpop.f32.mrf.mxu1  ;;  %2480 = vmatprep.subr.mxu1 %v2930_v22  ;;  %v589_v41 = vadd.f32 %v2329_v27, %v588_v39  ;;  %v600_v46 = vmul.f32 0.17677669, %v594_v44 }
 0x179   : > { %v701_v40 = vadd.f32 %v2334_v25, %v700_v38  ;;  %1459 = vrot.lane.b32.xlu1 %v597_v37, %s2932_s1 }
 0x17a   : > { %2478 = vmatmul.mubr.msk.f32.vlgmr.msra.gmra.mxu1 %vm817_vm2, %v597_v37  ;;  %v599_v43 = vmul.f32 0.17677669, %v589_v41 }
 0x17b   : > { %2481 = vmatpush3.xpose.msk.msra.mxu1 %vm817_vm2, %v696_v29  ;;  %2486 = vmatpush3.xpose.msk.msra.mxu0 %vm817_vm2, %v701_v40  ;;  %v2471_v48 = vpop.f32.mrf.mxu0 }
 0x17c   : > { %2482 = vmatprep.mubr.msk.f32.mxu1 %vm2931_vm1, %v2930_v22  ;;  %2490 = vmatprep.subr.mxu1 %v2930_v22  ;;  %v3315_v49 = vadd.f32 %v2471_v48, %v2339_v47 }
 0x17d   : > { %1537 = vrot.lane.b32.xlu1 %v598_v42, %s2932_s1  ;;  %2495 = vmatprep.subr.mxu0 %v2930_v22  ;;  %v798_v50 = vpop.f32.mrf.mxu0 }
 0x17e   : > { %2483 = vmatmul.mubr.msk.f32.vlgmr.msra.gmra.mxu1 %vm817_vm2, %v598_v42  ;;  %2488 = vmatmul.mubr.msk.f32.vlgmr.msra.gmra.mxu0 %vm817_vm2, %v599_v43  ;;  %v3317_v51 = vadd.f32 %v2339_v47, %v798_v50 }
 0x17f   : > { %2491 = vmatpush3.xpose.msk.msra.mxu1 %vm817_vm2, %v706_v45  ;;  %2492 = vmatprep.mubr.msk.f32.mxu1 %vm2931_vm1, %v2930_v22  ;;  %v2474_v52 = vpop.f32.mrf.mxu0 }
 0x180   : > { %2500 = vmatprep.subr.mxu1 %v2930_v22  ;;  %2497 = vmatprep.mubr.msk.f32.mxu0 %vm2931_vm1, %v2930_v22  ;;  %v3321_v53 = vadd.f32 %v2474_v52, %v2339_v47 }
 0x181   : > { %2496 = vmatpush3.msra.mxu0 %v3317_v51  ;;  %v808_v56 = vpop.f32.mrf.mxu0 }
 0x182   : > { %2493 = vmatmul.mubr.msk.f32.vlgmr.msra.gmra.mxu1 %vm817_vm2, %v600_v46  ;;  %2505 = vmatprep.subr.mxu0 %v2930_v22  ;;  %v809_v19 = vadd.f32 %v2339_v47, %v808_v56 }
 0x183   : > { %2502 = vmatprep.mubr.msk.f32.mxu1 %vm2931_vm1, %v2930_v22  ;;  %2501 = vmatpush3.msra.mxu1 %v3315_v49 }
 0x184   : > { %2510 = vmatprep.subr.mxu1 %v2930_v22 }
 0x1e7   : > { %v1540_v3 = vpop.permute.xlu1 %1539 }
 0x1eb   : > { %v1460_v4 = vpop.permute.xlu1 %1459 }
 0x1ef   : > { %v1538_v5 = vpop.permute.xlu1 %1537 }
 0x23a   : > { %v890_v54 = vpop.f32.mrf.mxu1 }
 0x23b   : > { %v1123_v55 = vsel %vm1122_vm3, %v890_v54, -inf }
 0x23c   : > { %1124 = vmax.xlane.f32.xlu0 %v1123_v55  ;;  %v2479_v57 = vpop.f32.mrf.mxu1 }
 0x23e   : > { %v966_v58 = vpop.f32.mrf.mxu1  ;;  %v1042_v59 = vpop.f32.mrf.mxu0 }
 0x23f   : > { %v1129_v60 = vsel %vm1122_vm3, %v1042_v59, -inf  ;;  %v1126_v61 = vsel %vm1122_vm3, %v966_v58, -inf }
 0x240   : > { %1130 = vmax.xlane.f32.xlu1 %v1129_v60  ;;  %1127 = vmax.xlane.f32.xlu0 %v1126_v61  ;;  %v2484_v62 = vpop.f32.mrf.mxu1  ;;  %v2489_v63 = vpop.f32.mrf.mxu0 }
 0x242   : > { %v1118_v0 = vpop.f32.mrf.mxu1 }
 0x243   : > { %v1132_v1 = vsel %vm1122_vm3, %v1118_v0, -inf }
 0x244   : > { %1133 = vmax.xlane.f32.xlu1 %v1132_v1  ;;  %v2494_v2 = vpop.f32.mrf.mxu1 }
 0x255   : > { %1695 = vrot.lane.b32.xlu1 %v706_v45, %s2932_s1 }
 0x256   : > { %1461 = vrot.lane.b32.xlu0 %v3286_v33, %s2932_s1 }
 0x259   : > { %1693 = vrot.lane.b32.xlu1 %v600_v46, %s2932_s1 }
 0x25a   : > { %1617 = vrot.lane.b32.xlu0 %v701_v40, %s2932_s1 }
 0x25e   : > { %1615 = vrot.lane.b32.xlu0 %v599_v43, %s2932_s1 }
 0x2c5   : > { %v1125_v6 = vpop.xlane.xlu0 %1124 }
 0x2c6   : > { %v1135_v7 = vsub.f32 %v890_v54, %v1125_v6 }
 0x2c8   : > { %v1139_v8 = vmul.f32 1.442695, %v1135_v7 }
 0x2c9   : > { %v1131_v9 = vpop.xlane.xlu1 %1130  ;;  %v1128_v10 = vpop.xlane.xlu0 %1127 }
 0x2ca   : > { %2650 = vpow2.f32 %v1139_v8  ;;  %v1137_v11 = vsub.f32 %v1042_v59, %v1131_v9  ;;  %v1136_v12 = vsub.f32 %v966_v58, %v1128_v10 }
 0x2cc   : > { %v1143_v13 = vmul.f32 1.442695, %v1137_v11  ;;  %v1141_v14 = vmul.f32 1.442695, %v1136_v12 }
 0x2cd   : > { %v1134_v15 = vpop.xlane.xlu1 %1133  ;;  %v1462_v20 = vpop.permute.xlu0 %1461 }
 0x2ce   : > { %2652 = vpow2.f32 %v1143_v13  ;;  %v1138_v16 = vsub.f32 %v1118_v0, %v1134_v15 }
 0x2cf   : > { %2654 = vpow2.f32 %v1141_v14 }
 0x2d0   : > { %v1145_v17 = vmul.f32 1.442695, %v1138_v16 }
 0x2d1   : > { %v1618_v24 = vpop.permute.xlu0 %1617  ;;  %v1696_v26 = vpop.permute.xlu1 %1695 }
 0x2d2   : > { %2656 = vpow2.f32 %v1145_v17 }
 0x2d5   : > { %v1616_v27 = vpop.permute.xlu0 %1615  ;;  %v1694_v28 = vpop.permute.xlu1 %1693 }
 0x2d7   : > { %v3335_v18 = vpop.eup %2650 }
 0x2d8   : > { %2498 = vmatmul.mubr.msk.f32.vlgmr.msra.gmra.mxu0 %vm1122_vm3, %v3335_v18  ;;  %v1147_v11 = vsel %vm1122_vm3, %v3335_v18, 0.0 }
 0x2d9   : > { %2506 = vmatpush3.msra.mxu0 %v809_v19  ;;  %2507 = vmatprep.mubr.msk.f32.mxu0 %vm2931_vm1, %v2930_v22 }
 0x2da   : > { %2515 = vmatprep.subr.mxu0 %v2930_v22 }
 0x2db   : > { %v3342_v21 = vpop.eup %2652 }
 0x2dc   : > { %v3344_v23 = vpop.eup %2654  ;;  %2508 = vmatmul.mubr.msk.f32.vlgmr.msra.gmra.mxu0 %vm1122_vm3, %v3342_v21 }
 0x2dd   : > { %2503 = vmatmul.mubr.msk.f32.vlgmr.msra.gmra.mxu1 %vm1122_vm3, %v3344_v23  ;;  %2516 = vmatpush3.xpose.msk.msra.mxu0 %vm817_vm2, %v1462_v20  ;;  %v1150_v8 = vsel %vm1122_vm3, %v3344_v23, 0.0 }
 0x2de   : > { %2511 = vmatpush3.msra.mxu1 %v3321_v53  ;;  %2512 = vmatprep.mubr.msk.f32.mxu1 %vm2931_vm1, %v2930_v22 }
 0x2df   : > { %v3354_v25 = vpop.eup %2656  ;;  %2517 = vmatprep.mubr.msk.f32.mxu0 %vm2931_vm1, %v2930_v22  ;;  %2520 = vmatprep.subr.mxu1 %v2930_v22 }
 0x2e0   : > { %2525 = vmatprep.subr.mxu0 %v2930_v22  ;;  %2518 = vmatmul.mubr.msk.f32.vlgmr.msra.gmra.mxu0 %vm817_vm2, %v1460_v4  ;;  %v1156_v10 = vsel %vm1122_vm3, %v3354_v25, 0.0 }
 0x2e1   : > { %2513 = vmatmul.mubr.msk.f32.vlgmr.msra.gmra.mxu1 %vm1122_vm3, %v3354_v25  ;;  %2526 = vmatpush3.xpose.msk.msra.mxu0 %vm817_vm2, %v1618_v24 }
 0x2e2   : > { %2521 = vmatpush3.xpose.msk.msra.mxu1 %vm817_vm2, %v1540_v3  ;;  %2522 = vmatprep.mubr.msk.f32.mxu1 %vm2931_vm1, %v2930_v22 }
 0x2e3   : > { %2527 = vmatprep.mubr.msk.f32.mxu0 %vm2931_vm1, %v2930_v22  ;;  %2530 = vmatprep.subr.mxu1 %v2930_v22 }
 0x2e4   : > { %2528 = vmatmul.mubr.msk.f32.vlgmr.msra.gmra.mxu0 %vm817_vm2, %v1616_v27  ;;  %2535 = vmatprep.subr.mxu0 %v2930_v22 }
 0x2e5   : > { %2523 = vmatmul.mubr.msk.f32.vlgmr.msra.gmra.mxu1 %vm817_vm2, %v1538_v5  ;;  %2537 = vmatprep.mubr.msk.f32.mxu0 %vm2931_vm1, %v2930_v22 }
 0x2e6   : > { %2531 = vmatpush3.xpose.msk.msra.mxu1 %vm817_vm2, %v1696_v26  ;;  %2532 = vmatprep.mubr.msk.f32.mxu1 %vm2931_vm1, %v2930_v22 }
 0x2e7   : > { %2540 = vmatprep.subr.mxu1 %v2930_v22 }
 0x2e9   : > { %2533 = vmatmul.mubr.msk.f32.vlgmr.msra.gmra.mxu1 %vm817_vm2, %v1694_v28 }
 0x2ea   : > { %2542 = vmatprep.mubr.msk.f32.mxu1 %vm2931_vm1, %v2930_v22 }
 0x398   : > { %v3382_v29 = vpop.f32.mrf.mxu0 }
 0x39a   : > { %v2499_v30 = vpop.f32.mrf.mxu0 }
 0x39c   : > { %v3384_v31 = vpop.f32.mrf.mxu0 }
 0x39d   : > { %v3386_v32 = vpop.f32.mrf.mxu1 }
 0x39e   : > { %v2509_v33 = vpop.f32.mrf.mxu0 }
 0x39f   : > { %v2504_v34 = vpop.f32.mrf.mxu1 }
 0x3a0   : > { %v1533_v35 = vpop.f32.mrf.mxu0 }
 0x3a1   : > { %v3388_v36 = vpop.f32.mrf.mxu1  ;;  %v1771_v37 = vsel %vm1122_vm3, %v1533_v35, -inf }
 0x3a2   : > { %1772 = vmax.xlane.f32.xlu0 %v1771_v37  ;;  %v2519_v38 = vpop.f32.mrf.mxu0 }
 0x3a3   : > { %v2514_v39 = vpop.f32.mrf.mxu1 }
 0x3a4   : > { %v1689_v40 = vpop.f32.mrf.mxu0 }
 0x3a5   : > { %v1611_v41 = vpop.f32.mrf.mxu1  ;;  %v1777_v42 = vsel %vm1122_vm3, %v1689_v40, -inf }
 0x3a6   : > { %1778 = vmax.xlane.f32.xlu0 %v1777_v42  ;;  %v2529_v43 = vpop.f32.mrf.mxu0  ;;  %v1774_v44 = vsel %vm1122_vm3, %v1611_v41, -inf }
 0x3a7   : > { %1775 = vmax.xlane.f32.xlu1 %v1774_v44  ;;  %v2524_v45 = vpop.f32.mrf.mxu1 }
 0x3a9   : > { %v1767_v46 = vpop.f32.mrf.mxu1 }
 0x3aa   : > { %v1780_v47 = vsel %vm1122_vm3, %v1767_v46, -inf }
 0x3ab   : > { %1781 = vmax.xlane.f32.xlu0 %v1780_v47  ;;  %v2534_v48 = vpop.f32.mrf.mxu1 }
 0x3b8   : > { %1885 = vrot.lane.b32.xlu1 %v3315_v49, %s2932_s1 }
 0x3bc   : > { %1962 = vrot.lane.b32.xlu1 %v809_v19, %s2932_s1 }
 0x3c0   : > { %2039 = vrot.lane.b32.xlu1 %v3321_v53, %s2932_s1 }
 0x3c1   : > { %1808 = vrot.lane.b32.xlu0 %v3317_v51, %s2932_s1 }
 0x42b   : > { %v1773_v50 = vpop.xlane.xlu0 %1772 }
 0x42c   : > { %v1783_v52 = vsub.f32 %v1533_v35, %v1773_v50 }
 0x42e   : > { %v1787_v54 = vmul.f32 1.442695, %v1783_v52 }
 0x42f   : > { %v1779_v55 = vpop.xlane.xlu0 %1778 }
 0x430   : > { %2658 = vpow2.f32 %v1787_v54  ;;  %v1785_v56 = vsub.f32 %v1689_v40, %v1779_v55  ;;  %v1776_v57 = vpop.xlane.xlu1 %1775 }
 0x431   : > { %v1784_v58 = vsub.f32 %v1611_v41, %v1776_v57 }
 0x432   : > { %v1791_v59 = vmul.f32 1.442695, %v1785_v56 }
 0x433   : > { %v1789_v60 = vmul.f32 1.442695, %v1784_v58 }
 0x434   : > { %2660 = vpow2.f32 %v1791_v59  ;;  %v1886_v49 = vpop.permute.xlu1 %1885  ;;  %v1782_v61 = vpop.xlane.xlu0 %1781 }
 0x435   : > { %2662 = vpow2.f32 %v1789_v60  ;;  %v1786_v62 = vsub.f32 %v1767_v46, %v1782_v61  ;;  %2541 = vmatpush3.msra.mxu1 %v1886_v49 }
 0x436   : > { %2550 = vmatprep.subr.mxu1 %v2930_v22 }
 0x437   : > { %v1793_v53 = vmul.f32 1.442695, %v1786_v62 }
 0x438   : > { %v1809_v51 = vpop.permute.xlu0 %1808  ;;  %v1963_v0 = vpop.permute.xlu1 %1962 }
 0x439   : > { %2664 = vpow2.f32 %v1793_v53  ;;  %2536 = vmatpush3.msra.mxu0 %v1809_v51 }
 0x43a   : > { %2545 = vmatprep.subr.mxu0 %v2930_v22 }
 0x43c   : > { %v2040_v5 = vpop.permute.xlu1 %2039 }
 0x43d   : > { %v2659_v63 = vpop.eup %2658 }
 0x43e   : > { %2538 = vmatmul.mubr.msk.f32.vlgmr.msra.gmra.mxu0 %vm1122_vm3, %v2659_v63  ;;  %v1795_v1 = vsel %vm1122_vm3, %v2659_v63, 0.0 }
 0x43f   : > { %2546 = vmatpush3.msra.mxu0 %v1963_v0  ;;  %1796 = vadd.xlane.f32.xlu0 %v1795_v1 }
 0x440   : > { %2547 = vmatprep.mubr.msk.f32.mxu0 %vm2931_vm1, %v2930_v22 }
 0x441   : > { %v2661_v2 = vpop.eup %2660 }
 0x442   : > { %v2663_v3 = vpop.eup %2662  ;;  %2548 = vmatmul.mubr.msk.f32.vlgmr.msra.gmra.mxu0 %vm1122_vm3, %v2661_v2  ;;  %v1801_v4 = vsel %vm1122_vm3, %v2661_v2, 0.0 }
 0x443   : > { %2543 = vmatmul.mubr.msk.f32.vlgmr.msra.gmra.mxu1 %vm1122_vm3, %v2663_v3  ;;  %v1798_v6 = vsel %vm1122_vm3, %v2663_v3, 0.0  ;;  %1802 = vadd.xlane.f32.xlu0 %v1801_v4 }
 0x444   : > { %2551 = vmatpush3.msra.mxu1 %v2040_v5  ;;  %1799 = vadd.xlane.f32.xlu1 %v1798_v6 }
 0x445   : > { %2552 = vmatprep.mubr.msk.f32.mxu1 %vm2931_vm1, %v2930_v22  ;;  %v1153_v22 = vsel %vm1122_vm3, %v3342_v21, 0.0 }
 0x446   : > { %v2665_v7 = vpop.eup %2664 }
 0x447   : > { %2553 = vmatmul.mubr.msk.f32.vlgmr.msra.gmra.mxu1 %vm1122_vm3, %v2665_v7  ;;  %v1804_v9 = vsel %vm1122_vm3, %v2665_v7, 0.0 }
 0x448   : > { %1151 = vadd.xlane.f32.xlu1 %v1150_v8  ;;  %1805 = vadd.xlane.f32.xlu0 %v1804_v9 }
 0x44c   : > { %1157 = vadd.xlane.f32.xlu1 %v1156_v10  ;;  %1148 = vadd.xlane.f32.xlu0 %v1147_v11 }
 0x450   : > { %1154 = vadd.xlane.f32.xlu0 %v1153_v22 }
 0x4c8   : > { %v1797_v12 = vpop.xlane.xlu0 %1796 }
 0x4c9   : > { %2666 = vrcp.f32 %v1797_v12 }
 0x4cc   : > { %v1803_v14 = vpop.xlane.xlu0 %1802 }
 0x4cd   : > { %v1800_v13 = vpop.xlane.xlu1 %1799 }
 0x4ce   : > { %2668 = vrcp.f32 %v1800_v13 }
 0x4cf   : > { %2670 = vrcp.f32 %v1803_v14 }
 0x4d1   : > { %v1806_v15 = vpop.xlane.xlu0 %1805  ;;  %v1152_v38 = vpop.xlane.xlu1 %1151 }
 0x4d2   : > { %2672 = vrcp.f32 %v1806_v15 }
 0x4d5   : > { %v1149_v37 = vpop.xlane.xlu0 %1148  ;;  %v1158_v40 = vpop.xlane.xlu1 %1157 }
 0x4d6   : > { %v2667_v16 = vpop.eup %2666  ;;  %2674 = vrcp.f32 %v1149_v37 }
 0x4d7   : > { %2676 = vrcp.f32 %v1152_v38 }
 0x4d9   : > { %v1155_v39 = vpop.xlane.xlu0 %1154 }
 0x4da   : > { %2678 = vrcp.f32 %v1155_v39 }
 0x4db   : > { %v2669_v23 = vpop.eup %2668  ;;  %2680 = vrcp.f32 %v1158_v40 }
 0x4dc   : > { %v2671_v27 = vpop.eup %2670 }
 0x4df   : > { %v2673_v34 = vpop.eup %2672 }
 0x4e3   : > { %v2675_v41 = vpop.eup %2674 }
 0x4e4   : > { %v1455_v42 = vmul.f32 %v2675_v41, %v3382_v29  ;;  %v2677_v44 = vpop.eup %2676 }
 0x4e5   : > { %v1456_v46 = vmul.f32 %v2677_v44, %v3386_v32 }
 0x4e7   : > { %v2679_v47 = vpop.eup %2678 }
 0x4e8   : > { %v1457_v29 = vmul.f32 %v2679_v47, %v3384_v31  ;;  %v2681_v52 = vpop.eup %2680 }
 0x4e9   : > { %v1458_v32 = vmul.f32 %v2681_v52, %v3388_v36 }
 0x4fe   : > { %v1880_v17 = vpop.f32.mrf.mxu0 }
 0x4ff   : > { %v2119_v19 = vmul.f32 %v2667_v16, %v1880_v17 }
 0x500   : > { %v2539_v20 = vpop.f32.mrf.mxu0 }
 0x501   : > { %2127 = vrot.lane.b32.xlu0 %v2119_v19, %s2933_s26 }
 0x502   : > { %v2034_v18 = vpop.f32.mrf.mxu0 }
 0x503   : > { %v1957_v24 = vpop.f32.mrf.mxu1  ;;  %v2121_v30 = vmul.f32 %v2671_v27, %v2034_v18 }
 0x504   : > { %v2120_v25 = vmul.f32 %v2669_v23, %v1957_v24  ;;  %v2549_v21 = vpop.f32.mrf.mxu0 }
 0x505   : > { %v2544_v26 = vpop.f32.mrf.mxu1 }
 0x506   : > { %2129 = vrot.lane.b32.xlu1 %v2120_v25, %s2933_s26 }
 0x507   : > { %v2111_v28 = vpop.f32.mrf.mxu1 }
 0x508   : > { %v2122_v35 = vmul.f32 %v2673_v34, %v2111_v28 }
 0x509   : > { %v2554_v33 = vpop.f32.mrf.mxu1 }
 0x50a   : > { %2131 = vrot.lane.b32.xlu1 %v2121_v30, %s2933_s26 }
 0x50e   : > { %2133 = vrot.lane.b32.xlu1 %v2122_v35, %s2933_s26 }
 0x573   : > { %v2128_v43 = vpop.permute.xlu0 %2127 }
 0x574   : > { %v2139_v45 = vsel %vm817_vm2, %v1455_v42, %v2128_v43 }
 0x575   : > { %2143 = vst.msk [vmem:[%s471_s29] sm:$0xff] %vm499_vm0, %v2139_v45 }
 0x578   : > { %v2130_v48 = vpop.permute.xlu1 %2129 }
 0x579   : > { %v2140_v50 = vsel %vm817_vm2, %v1456_v46, %v2130_v48 }
 0x57a   : > { %2144 = vst.msk [vmem:[%s471_s29 + $0x8] sm:$0xff] %vm499_vm0, %v2140_v50 }
 0x57c   : > { %v2132_v54 = vpop.permute.xlu1 %2131 }
 0x57d   : > { %v2141_v55 = vsel %vm817_vm2, %v1457_v29, %v2132_v54 }
 0x57e   : > { %2145 = vst.msk [vmem:[%s471_s29 + $0x10] sm:$0xff] %vm499_vm0, %v2141_v55 }
 0x580   : > { %v2134_v31 = vpop.permute.xlu1 %2133 }
 0x581   : > { %v2142_v56 = vsel %vm817_vm2, %v1458_v32, %v2134_v31 }
 0x582   : > { %2146 = vst.msk [vmem:[%s471_s29 + $0x18] sm:$0xff] %vm499_vm0, %v2142_v56 }
 0x583   : > { %2857 = shalt.err (!%p2854_p10)
}
 0x584   : > { %s2858_s16 = scalar_lea.hbm %s3440_s24, 512  ;;  %s2862_s7 = scalar_lea.hbm %s3548_s18, 1024 }
 0x585   : > { %p2859_p11 = scmp.ne.s32.totalorder %s3440_s24, %s2858_s16  ;;  %p2863_p5 = scmp.lt.s32.totalorder %s3440_s24, %s3548_s18 }
 0x586   : > { %p2864_p12 = scmp.lt.s32.totalorder %s2862_s7, %s2858_s16 }
 0x587   : > { %p2860_p1 = pnand %p2859_p11, %p3549_p2 }
 0x588   : > { %p2865_p0 = por %p2864_p12, %p2863_p5 }
 0x589   : > { %p2861_p4 = pneg %p2860_p1 }
 0x58b   : > { %p2866_p13 = pnand %p2865_p0, %p2861_p4 }
 0x58d   : > { %2869 = shalt.err (!%p2866_p13)
}
 0x58e   : > { %s2935_s25 = smov 128   ;;  %s2936_s12 = smov 8  }
 0x58f   : > { %2573 = dma.vmem_to_hbm [thread:$0]  (%p3549_p2), %s3433_s17, 512, %s3440_s24, %s2148_s13, %s2935_s25, %s2935_s25, %s2936_s12  }
 0x590 PF: > { %s3550_s26 = sld [smem:[#allocation19_spill]] }
 0x591   : > { %s3551_s29 = sld [smem:[#allocation23_spill]] }
 0x592   : > { %s3552_s5 = sld [smem:[#allocation20_spill]] }
 0x596   : > { %s2176_s28 = sand.u32 1, %s3550_s26  }
 0x597   : > { %p3553_p7 = scmp.ne.s32.totalorder %s3551_s29, 0  ;;  %s2177_s15 = scalar_lea.sflag [#allocation4], %s2176_s28 }
 0x598   : > { %p3554_p3 = scmp.ge.s32.totalorder %s3552_s5, 2 }
 0x59a   : > { %p2596_p6 = pnand %p3554_p3, %p3553_p7 }
 0x59c   : > { %p2597_p8 = pneg %p2596_p6 }
 0x59e   : > { %2903 = dma.done.wait (%p2597_p8), %s2177_s15, 512  }
 0x59f   : > { %2905 = vsyncadd (%p2597_p8), %s2177_s15, 4294966784  ;;  %s3555_s12 = sld [smem:[#allocation21_spill]]  ;;  %s3557_s30 = smov %s2912_s10 }
 0x5a0   : > { %s3556_s27 = sld [smem:[#allocation22_spill]]  ;;  %s3558_s10 = smov %s2916_s11 }
 0x5a5   : > { %p27_p9 = scmp.ge.s32.totalorder %s3555_s12, 4  }
 0x5a6   : > { %s3559_s11 = smov %s3556_s27 }
 0x5a7   :  { %29 = sbr.rel (!%p27_p9) target bundleno = 15 (0xf), region = 137 }
 0x5ac   :  { %2182 = vsyncpa [#allocation3], 1 }
 0x5ad   :  { %2184 = vsyncpa [#allocation3 + $0x1], 1 }
 0x5ae   :  { %2185 = vsyncpa [#allocation6], 1 }
 0x5af   :  { %2187 = vsyncpa [#allocation6 + $0x1], 1 }
 0x5b0   :  { %2188 = vsyncpa [#allocation9], 1 }
 0x5b1   :  { %2189 = vsyncpa [#allocation12], 1 }
 0x5b2   :  { %2190 = vsyncpa [#allocation4], 1 }
 0x5b3   :  { %2192 = vsyncpa [#allocation4 + $0x1], 1 }

</bundles_post_ra>
